<compile_context>
chip_gen: v7x
topology: tpu7x:2x2x1
jax: 0.10.0
libtpu: 0.0.40
codegen_flags: <defaults>
</compile_context>

<pallas_src>
import jax
import jax.numpy as jnp
import numpy as np
from jax.experimental import pallas as pl
from jax.experimental.pallas import tpu as pltpu

# ----------------------------- config -------------------------------------
N_AGENTS = 16
N_AGENT_TYPES = 4
N_DIM = 32                # latent skill dimension (D)
N_DIM_ITEM_EMBED = 64     # item embedding dimension (E)
REL_TEMPERATURE = 0.5
N_LANES = 128             # packed output width: [dif(D) | rel(D) | logits(1) | pad]
BATCH = 8


def _round_up(n, m):
    return ((n + m - 1) // m) * m


def _choose_tile(batch):
    """Largest tile in {2048..128} that keeps >= 2 grid steps; else one padded tile."""
    for tb in (2048, 1024, 512, 256, 128):
        if batch >= 2 * tb:
            return tb
    return max(8, _round_up(batch, 8))


# ----------------------------- kernel --------------------------------------
def caimira_kernel(x_ref, skills_ref, w_ref, b_ref, out_ref):
    D = skills_ref.shape[-1]

    x = x_ref[...]            # (TB, E)  f32
    skills = skills_ref[...]  # (TB, D)  f32 (already gathered + type emb)
    w = w_ref[...]            # (E, 128) [W_dif | W_rel/T | 0...]
    b = b_ref[...]            # (1, 128) [-mean_x@W_dif | b_rel/T | guess_bias | 0...]

    # Single fused 128-lane MXU matmul; dif/rel/logit lanes land in packed positions.
    cat = jnp.dot(x, w, preferred_element_type=jnp.float32) + b      # (TB, 128)

    lane = jax.lax.broadcasted_iota(jnp.int32, cat.shape, dimension=1)
    dif_mask = lane < D
    rel_mask = (lane >= D) & (lane < 2 * D)
    logit_mask = lane == 2 * D

    # --- item relevance: masked softmax over the rel lanes (packed, exact divide) ----
    z = jnp.where(rel_mask, cat, -jnp.inf)
    m = jnp.max(z, axis=-1, keepdims=True)
    e = jnp.exp(z - m)                         # exp(-inf) == 0 on masked lanes
    denom = jnp.sum(e, axis=-1, keepdims=True)
    rel_p = e / denom                          # nonzero only on rel lanes

    # --- item difficulty (centering already folded into the bias) --------------------
    dif_p = jnp.where(dif_mask, cat, 0.0)      # nonzero only on dif lanes

    # --- logits = sum((skills - dif) * rel) + guess_bias ------------------------------
    # guess_bias is baked into cat[:, 2D] (weight column there is zero).
    dif = cat[:, :D]                           # (TB, D)
    rel = rel_p[:, D:2 * D]                    # (TB, D)
    inner = jnp.sum((skills - dif) * rel, axis=-1, keepdims=True)     # (TB, 1)

    # Lane-dense packed writeback: [dif | rel | logits | 0].
    out_ref[...] = dif_p + rel_p + jnp.where(logit_mask, cat + inner, 0.0)


# ----------------------------- param prep (one-time) ------------------------
def prepare_kernel_params(params, rel_temperature=REL_TEMPERATURE, n_lanes=N_LANES):
    """One-time parameter transform: pack heads to 128 lanes + fold 1/temperature."""
    E, D = params["w_dif"].shape
    assert 2 * D < n_lanes, "need a spare lane for the logits column"
    inv_t = jnp.float32(1.0 / rel_temperature)

    w_pack = jnp.zeros((E, n_lanes), jnp.float32)
    w_pack = w_pack.at[:, :D].set(params["w_dif"].astype(jnp.float32))
    w_pack = w_pack.at[:, D:2 * D].set(params["w_rel"].astype(jnp.float32) * inv_t)

    # Base bias: dif half is 0 (filled per call with -mean_x @ W_dif), rel half is
    # b_rel/T, lane 2D carries guess_bias, remaining lanes 0.
    b_pack = jnp.zeros((1, n_lanes), jnp.float32)
    b_pack = b_pack.at[:, D:2 * D].set(params["b_rel"].astype(jnp.float32) * inv_t)
    b_pack = b_pack.at[:, 2 * D].set(params["guess_bias"].astype(jnp.float32)[0, 0])

    return {
        "agent_emb": params["agent_emb"].astype(jnp.float32),
        "agent_type_emb": params["agent_type_emb"].astype(jnp.float32),
        "w_dif": params["w_dif"].astype(jnp.float32),   # for per-call centering fold
        "w_pack": w_pack,                                # (E, 128)
        "b_pack_base": b_pack,                           # (1, 128)
    }


# ----------------------------- wrapper --------------------------------------
def caimira_forward(agent_ids, item_embeddings, agent_type_ids, kparams):
    B, E = item_embeddings.shape
    D = kparams["agent_emb"].shape[-1]
    NL = kparams["w_pack"].shape[-1]

    # Glue: embedding gathers (pure indexing) stay in plain JAX.
    skills = (kparams["agent_emb"][agent_ids]
              + kparams["agent_type_emb"][agent_type_ids]).astype(jnp.float32)
    x = item_embeddings.astype(jnp.float32)

    # Fold the FULL-batch dif centering into the bias once per call:
    # dif = xW_dif + b_dif - mean(xW_dif + b_dif) == xW_dif - mean_x W_dif,
    # so the effective dif bias is -(mean_x @ W_dif); tiles stay independent.
    mean_x = jnp.mean(x, axis=0, keepdims=True)          # (1, E)
    dif_bias = -(mean_x @ kparams["w_dif"])               # (1, D)
    b_eff = kparams["b_pack_base"].at[:, :D].set(dif_bias)

    # Batch tiling: large tiles, cdiv grid with zero-padded tail (no whole-batch
    # fallback tile). Padded rows produce junk that is sliced off below.
    tb = _choose_tile(B)
    Bp = _round_up(B, tb)
    if Bp != B:
        x_p = jnp.pad(x, ((0, Bp - B), (0, 0)))
        skills_p = jnp.pad(skills, ((0, Bp - B), (0, 0)))
    else:
        x_p, skills_p = x, skills
    grid = (Bp // tb,)

    slab = pl.pallas_call(
        caimira_kernel,
        out_shape=jax.ShapeDtypeStruct((Bp, NL), jnp.float32),
        grid_spec=pltpu.PrefetchScalarGridSpec(
            num_scalar_prefetch=0,
            grid=grid,
            in_specs=[
                pl.BlockSpec((tb, E), lambda i: (i, 0)),      # item embedding tile
                pl.BlockSpec((tb, D), lambda i: (i, 0)),      # gathered skills tile
                pl.BlockSpec((E, NL), lambda i: (0, 0)),      # packed weight (resident)
                pl.BlockSpec((1, NL), lambda i: (0, 0)),      # packed bias (resident)
            ],
            out_specs=pl.BlockSpec((tb, NL), lambda i: (i, 0)),
        ),
        compiler_params=pltpu.CompilerParams(
            dimension_semantics=("parallel",)),   # independent batch tiles (v7x megacore)
    )(x_p, skills_p, kparams["w_pack"], b_eff)

    return {
        "logits": slab[:B, 2 * D],
        "skill": skills,                 # pass-through; no kernel copy
        "difficulty": slab[:B, :D],
        "relevance": slab[:B, D:2 * D],
    }


# ----------------------------- reference (pure JAX) --------------------------
def caimira_reference(agent_ids, item_embeddings, agent_type_ids, params):
    skills = params["agent_emb"][agent_ids] + params["agent_type_emb"][agent_type_ids]
    dif_raw = item_embeddings @ params["w_dif"] + params["b_dif"]
    dif = dif_raw - jnp.mean(dif_raw, axis=0, keepdims=True)
    rel_raw = item_embeddings @ params["w_rel"] + params["b_rel"]
    rel = jax.nn.softmax(rel_raw / REL_TEMPERATURE, axis=-1)
    logits = jnp.sum((skills - dif) * rel, axis=-1) + params["guess_bias"][0, 0]
    return {"logits": logits, "skill": skills, "difficulty": dif, "relevance": rel}


# ----------------------------- main -----------------------------------------
if __name__ == "__main__":
    key = jax.random.PRNGKey(0)
    k_ae, k_wd, k_bd, k_wr, k_br, k_gb = jax.random.split(key, 6)

    bound = 1.0 / np.sqrt(N_DIM_ITEM_EMBED)  # nn.Linear default uniform bound
    params = {
        # agent_embeddings.weight.data.normal_(0, 0.001)
        "agent_emb": 0.001 * jax.random.normal(k_ae, (N_AGENTS, N_DIM), jnp.float32),
        # create_zero_init_embedding -> zeros
        "agent_type_emb": jnp.zeros((N_AGENT_TYPES, N_DIM), jnp.float32),
        # nn.Linear(E, D) weights, stored pre-transposed as (E, D)
        "w_dif": jax.random.uniform(k_wd, (N_DIM_ITEM_EMBED, N_DIM),
                                    jnp.float32, -bound, bound),
        "b_dif": jax.random.uniform(k_bd, (1, N_DIM), jnp.float32, -bound, bound),
        "w_rel": jax.random.uniform(k_wr, (N_DIM_ITEM_EMBED, N_DIM),
                                    jnp.float32, -bound, bound),
        "b_rel": jax.random.uniform(k_br, (1, N_DIM), jnp.float32, -bound, bound),
        # module init is zeros(1); use a nonzero "trained" value to exercise the fold
        "guess_bias": jax.random.uniform(k_gb, (1, 1), jnp.float32, -0.2, 0.2),
    }
    kparams = prepare_kernel_params(params)   # one-time pack + temperature fold

    def run_case(batch, subkey):
        k_item_b, k_aid_b, k_tid_b = jax.random.split(subkey, 3)
        agent_ids = jax.random.randint(k_aid_b, (batch,), 0, N_AGENTS)
        agent_type_ids = jax.random.randint(k_tid_b, (batch,), 0, N_AGENT_TYPES)
        item_embeddings = jax.random.normal(
            k_item_b, (batch, N_DIM_ITEM_EMBED), jnp.float32)

        out = caimira_forward(agent_ids, item_embeddings, agent_type_ids, kparams)
        jax.block_until_ready(out)
        ref = caimira_reference(agent_ids, item_embeddings, agent_type_ids, params)
        for name in ("logits", "skill", "difficulty", "relevance"):
            np.testing.assert_allclose(np.asarray(out[name]), np.asarray(ref[name]),
                                       rtol=1e-5, atol=1e-5)

    # Small batch (single padded tile), 256-row batch (grid=2, megacore sharding),
    # and a non-multiple batch (cdiv grid + zero-padded tail).
    run_case(BATCH, jax.random.fold_in(key, 1))
    run_case(256, jax.random.fold_in(key, 2))
    run_case(300, jax.random.fold_in(key, 3))

    print("KERNEL_OK")
</pallas_src>

<mosaic_0001>
module attributes {stable_mosaic.version = 11 : i64} {
  func.func @caimira_kernel(%arg0: i32, %arg1: memref<8x64xf32, #tpu.memory_space<vmem>>, %arg2: memref<8x32xf32, #tpu.memory_space<vmem>>, %arg3: memref<64x128xf32, #tpu.memory_space<vmem>>, %arg4: memref<1x128xf32, #tpu.memory_space<vmem>>, %arg5: memref<8x128xf32, #tpu.memory_space<vmem>>) attributes {dimension_semantics = [#tpu.dimension_semantics<parallel>], iteration_bounds = array<i64: 1>, scalar_prefetch = 0 : i64, scratch_operands = 0 : i64, tpu.core_type = #tpu.core_type<tc>, window_params = [{transform_indices = @transform_0, window_bounds = array<i64: 8, 64>}, {transform_indices = @transform_1, window_bounds = array<i64: 8, 32>}, {pipeline_mode = #tpu.pipeline_mode<synchronous>, transform_indices = @transform_2, window_bounds = array<i64: 64, 128>}, {pipeline_mode = #tpu.pipeline_mode<synchronous>, transform_indices = @transform_3, window_bounds = array<i64: 1, 128>}, {transform_indices = @transform_4, window_bounds = array<i64: 8, 128>}]} {
    %c0 = arith.constant 0 : index
    %c0_0 = arith.constant 0 : index
    %0 = vector.load %arg1[%c0, %c0_0] : memref<8x64xf32, #tpu.memory_space<vmem>>, vector<8x64xf32>
    %c0_1 = arith.constant 0 : index
    %c0_2 = arith.constant 0 : index
    %1 = vector.load %arg2[%c0_1, %c0_2] : memref<8x32xf32, #tpu.memory_space<vmem>>, vector<8x32xf32>
    %c0_3 = arith.constant 0 : index
    %c0_4 = arith.constant 0 : index
    %2 = vector.load %arg3[%c0_3, %c0_4] : memref<64x128xf32, #tpu.memory_space<vmem>>, vector<64x128xf32>
    %c0_5 = arith.constant 0 : index
    %c0_6 = arith.constant 0 : index
    %3 = vector.load %arg4[%c0_5, %c0_6] : memref<1x128xf32, #tpu.memory_space<vmem>>, vector<1x128xf32>
    %cst = arith.constant dense<0.000000e+00> : vector<8x128xf32>
    %4 = tpu.matmul %0, %2, %cst {dimension_numbers = #tpu.dot_dimension_numbers<[1], [0], [0], [1], [0, 0, 1, 1], [], []>} : vector<8x64xf32>, vector<64x128xf32>, vector<8x128xf32> -> vector<8x128xf32>
    %5 = vector.broadcast %3 : vector<1x128xf32> to vector<8x128xf32>
    %6 = arith.addf %4, %5 : vector<8x128xf32>
    %7 = tpu.iota {dimensions = array<i32: 1>} : vector<8x128xi32>
    %c32_i32 = arith.constant 32 : i32
    %8 = vector.broadcast %c32_i32 : i32 to vector<8x128xi32>
    %9 = arith.cmpi slt, %7, %8 : vector<8x128xi32>
    %c32_i32_7 = arith.constant 32 : i32
    %10 = vector.broadcast %c32_i32_7 : i32 to vector<8x128xi32>
    %11 = arith.cmpi sge, %7, %10 : vector<8x128xi32>
    %c64_i32 = arith.constant 64 : i32
    %12 = vector.broadcast %c64_i32 : i32 to vector<8x128xi32>
    %13 = arith.cmpi slt, %7, %12 : vector<8x128xi32>
    %14 = arith.andi %11, %13 : vector<8x128xi1>
    %c64_i32_8 = arith.constant 64 : i32
    %15 = vector.broadcast %c64_i32_8 : i32 to vector<8x128xi32>
    %16 = arith.cmpi eq, %7, %15 : vector<8x128xi32>
    %cst_9 = arith.constant 0xFF800000 : f32
    %17 = vector.broadcast %cst_9 : f32 to vector<8x128xf32>
    %18 = arith.select %14, %6, %17 : vector<8x128xi1>, vector<8x128xf32>
    %cst_10 = arith.constant dense<0xFF800000> : vector<8xf32>
    %19 = vector.multi_reduction <maximumf>, %18, %cst_10 [1] : vector<8x128xf32> to vector<8xf32>
    %20 = vector.shape_cast %19 : vector<8xf32> to vector<8x1xf32>
    %21 = vector.broadcast %20 : vector<8x1xf32> to vector<8x128xf32>
    %22 = arith.subf %18, %21 : vector<8x128xf32>
    %23 = math.exp %22 : vector<8x128xf32>
    %cst_11 = arith.constant dense<0.000000e+00> : vector<8xf32>
    %24 = vector.multi_reduction <add>, %23, %cst_11 [1] : vector<8x128xf32> to vector<8xf32>
    %25 = vector.shape_cast %24 : vector<8xf32> to vector<8x1xf32>
    %26 = vector.broadcast %25 : vector<8x1xf32> to vector<8x128xf32>
    %27 = arith.divf %23, %26 : vector<8x128xf32>
    %cst_12 = arith.constant 0.000000e+00 : f32
    %28 = vector.broadcast %cst_12 : f32 to vector<8x128xf32>
    %29 = arith.select %9, %6, %28 : vector<8x128xi1>, vector<8x128xf32>
    %30 = vector.extract_strided_slice %6 {offsets = [0, 0], sizes = [8, 32], strides = [1, 1]} : vector<8x128xf32> to vector<8x32xf32>
    %31 = vector.extract_strided_slice %27 {offsets = [0, 32], sizes = [8, 32], strides = [1, 1]} : vector<8x128xf32> to vector<8x32xf32>
    %32 = arith.subf %1, %30 : vector<8x32xf32>
    %33 = arith.mulf %32, %31 : vector<8x32xf32>
    %cst_13 = arith.constant dense<0.000000e+00> : vector<8xf32>
    %34 = vector.multi_reduction <add>, %33, %cst_13 [1] : vector<8x32xf32> to vector<8xf32>
    %35 = vector.shape_cast %34 : vector<8xf32> to vector<8x1xf32>
    %36 = arith.addf %29, %27 : vector<8x128xf32>
    %37 = vector.broadcast %35 : vector<8x1xf32> to vector<8x128xf32>
    %38 = arith.addf %6, %37 : vector<8x128xf32>
    %cst_14 = arith.constant 0.000000e+00 : f32
    %39 = vector.broadcast %cst_14 : f32 to vector<8x128xf32>
    %40 = arith.select %16, %38, %39 : vector<8x128xi1>, vector<8x128xf32>
    %41 = arith.addf %36, %40 : vector<8x128xf32>
    %c0_15 = arith.constant 0 : index
    %c0_16 = arith.constant 0 : index
    %42 = vector.load %arg5[%c0_15, %c0_16] : memref<8x128xf32, #tpu.memory_space<vmem>>, vector<8x128xf32>
    tpu.vector_store %arg5[%c0_15, %c0_16], %41 {strides = array<i32>} : memref<8x128xf32, #tpu.memory_space<vmem>>, vector<8x128xf32>,
    return
  }
  func.func @transform_0(%arg0: i32) -> (i32, i32) {
    %c0_i32 = arith.constant 0 : i32
    %c0_i32_0 = arith.constant 0 : i32
    return %arg0, %c0_i32 : i32, i32
  }
  func.func @transform_1(%arg0: i32) -> (i32, i32) {
    %c0_i32 = arith.constant 0 : i32
    %c0_i32_0 = arith.constant 0 : i32
    return %arg0, %c0_i32 : i32, i32
  }
  func.func @transform_2(%arg0: i32) -> (i32, i32) {
    %c0_i32 = arith.constant 0 : i32
    %c0_i32_0 = arith.constant 0 : i32
    %c0_i32_1 = arith.constant 0 : i32
    return %c0_i32, %c0_i32_0 : i32, i32
  }
  func.func @transform_3(%arg0: i32) -> (i32, i32) {
    %c0_i32 = arith.constant 0 : i32
    %c0_i32_0 = arith.constant 0 : i32
    %c0_i32_1 = arith.constant 0 : i32
    return %c0_i32, %c0_i32_0 : i32, i32
  }
  func.func @transform_4(%arg0: i32) -> (i32, i32) {
    %c0_i32 = arith.constant 0 : i32
    %c0_i32_0 = arith.constant 0 : i32
    return %arg0, %c0_i32 : i32, i32
  }
}

</mosaic_0001>

<bundles_post_ra>
// kernel: tpu_custom_call.1
= control target key start
LH: loop header
LB: loop body
LE: loop exit
PB: predicated region body
PF: predicated region fallthrough
CT: control target
= control target key end

     0   :  { %9 = vsyncpa [#allocation3], 0  ;;  %s431_s0 = inlined_call_operand.hbm [shape: f32[8,64], index: 0, kind: input, shape index: {}]   ;;  %s432_s1 = inlined_call_operand.hbm [shape: f32[8,32], index: 1, kind: input, shape index: {}]   ;;  %s433_s2 = inlined_call_operand.hbm [shape: f32[64,128], index: 2, kind: input, shape index: {}]   ;;  %s434_s3 = inlined_call_operand.vmem [shape: f32[1,128], index: 3, kind: input, shape index: {}]   ;;  %s435_s4 = inlined_call_operand.hbm [shape: f32[8,128], index: 4, kind: output, shape index: {}]  }
   0x1   :  { %10 = vsyncpa [#allocation6], 0 }
   0x2   :  { %11 = vsyncpa [#allocation4], 0  ;;  %s345_s15 = smov [#allocation5]   ;;  %s346_s17 = smov [#allocation2]  }
   0x3   :  { %s28_s16 = sshll.u32 %s345_s15, 4  ;;  %s18_s18 = sshll.u32 %s346_s17, 4  ;;  %s29_s16 = int_to_ptr.vmem [resolvable:$true] %s28_s16  ;;  %s19_s18 = int_to_ptr.vmem [resolvable:$true] %s18_s18 }
   0x4   :  { %s251_s21 = scalar_lea.hbm %s432_s1, 128 }
   0x5   :  { %p252_p0 = scmp.ne.s32.totalorder %s432_s1, %s251_s21  ;;  %p255_p1 = scmp.lt.u32.totalorder %s251_s21, %s432_s1 }
   0x7   :  { %p257_p2 = pnand %p255_p1, %p252_p0 }
   0x9   :  { %260 = shalt.err (!%p257_p2)
}
   0xa   :  { %s261_s26 = scalar_lea.vmem %s29_s16, 128  ;;  %p266_p4 = scmp.lt.s32.totalorder %s29_s16, %s29_s16 }
   0xb   :  { %p262_p3 = scmp.ne.s32.totalorder %s29_s16, %s261_s26  ;;  %p267_p5 = scmp.lt.s32.totalorder %s261_s26, %s261_s26 }
   0xd   :  { %p268_p6 = por %p267_p5, %p266_p4 }
   0xf   :  { %p269_p7 = pnand %p268_p6, %p262_p3 }
  0x11   :  { %272 = shalt.err (!%p269_p7)
}
  0x12   :  { %31 = dma.hbm_to_vmem [thread:$0]  %s432_s1, 128, %s29_s16, [#allocation6]  }
  0x13   :  { %s273_s5 = scalar_lea.hbm %s431_s0, 128 }
  0x14   :  { %p274_p8 = scmp.ne.s32.totalorder %s431_s0, %s273_s5  ;;  %p277_p9 = scmp.lt.u32.totalorder %s273_s5, %s431_s0 }
  0x16   :  { %p279_p10 = pnand %p277_p9, %p274_p8 }
  0x18   :  { %282 = shalt.err (!%p279_p10)
}
  0x19   :  { %s283_s10 = scalar_lea.vmem %s19_s18, 128  ;;  %p288_p12 = scmp.lt.s32.totalorder %s19_s18, %s19_s18 }
  0x1a   :  { %p284_p11 = scmp.ne.s32.totalorder %s19_s18, %s283_s10  ;;  %p289_p13 = scmp.lt.s32.totalorder %s283_s10, %s283_s10 }
  0x1c   :  { %p290_p0 = por %p289_p13, %p288_p12 }
  0x1e   :  { %p291_p1 = pnand %p290_p0, %p284_p11 }
  0x20   :  { %294 = shalt.err (!%p291_p1)
}
  0x21   :  { %21 = dma.hbm_to_vmem [thread:$0]  %s431_s0, 128, %s19_s18, [#allocation3]  }
  0x22   :  { %s347_s12 = smov [#allocation7]   ;;  %s295_s16 = scalar_lea.hbm %s433_s2, 1024 }
  0x23   :  { %s37_s13 = sshll.u32 %s347_s12, 4  ;;  %p296_p2 = scmp.ne.s32.totalorder %s433_s2, %s295_s16  ;;  %s38_s13 = int_to_ptr.vmem [resolvable:$true] %s37_s13 }
  0x24   :  { %p299_p3 = scmp.lt.u32.totalorder %s295_s16, %s433_s2 }
  0x26   :  { %p301_p4 = pnand %p299_p3, %p296_p2 }
  0x28   :  { %304 = shalt.err (!%p301_p4)
}
  0x29   :  { %s305_s22 = scalar_lea.vmem %s38_s13, 1024  ;;  %p310_p6 = scmp.lt.s32.totalorder %s38_s13, %s38_s13 }
  0x2a   :  { %p306_p5 = scmp.ne.s32.totalorder %s38_s13, %s305_s22  ;;  %p311_p7 = scmp.lt.s32.totalorder %s305_s22, %s305_s22 }
  0x2c   :  { %p312_p8 = por %p311_p7, %p310_p6 }
  0x2e   :  { %p313_p9 = pnand %p312_p8, %p306_p5 }
  0x30   :  { %316 = shalt.err (!%p313_p9)
}
  0x31   :  { %s348_s0 = smov 128   ;;  %s349_s18 = smov 8  }
  0x32   :  { %43 = dma.hbm_to_vmem [thread:$0]  %s433_s2, 1024, %s38_s13, [#allocation6], %s348_s0, %s348_s0, %s349_s18  }
  0x33   :  { %339 = dma.done.wait [#allocation3], 128  }
  0x34   :  { %340 = vsyncadd [#allocation3], 4294967168 }
  0x35   :  { %341 = dma.done.wait [#allocation6], 1152  }
  0x36   :  { %342 = vsyncadd [#allocation6], 4294966144  ;;  %v350_v0 = vmov 0.0|0.0   ;;  %vm351_vm0 = vmmov 0   ;;  %v352_v1 = vmov 0.0   ;;  %v57_v2 = vld [vmem:[#allocation7] sm:$0xff]  ;;  %v146_v15 = vlaneseq }
  0x37   :  { %225 = vmatprep.subr.bf16.mxu0 %v350_v0  ;;  %222 = vmatprep.mubr.msk.f32.mxu0 %vm351_vm0, %v352_v1  ;;  %v58_v3 = vld [vmem:[#allocation7 + $0x8] sm:$0xff]  ;;  %v59_v4 = vld [vmem:[#allocation7 + $0x10] sm:$0xff]  ;;  %v60_v6 = vld [vmem:[#allocation7 + $0x18] sm:$0xff]  ;;  %vm72_vm1 = vcmask 523264   ;;  %s353_s26 = smov 96   ;;  %vm170_vm5 = vcmask 261120  }
  0x38   :  { %v226_v5 = vpack.c.bf16 %v58_v3, %v57_v2  ;;  %v229_v7 = vpack.c.bf16 %v60_v6, %v59_v4  ;;  %v61_v8 = vld [vmem:[#allocation7 + $0x20] sm:$0xff]  ;;  %v62_v9 = vld [vmem:[#allocation7 + $0x28] sm:$0xff]  ;;  %v63_v11 = vld [vmem:[#allocation7 + $0x30] sm:$0xff]  ;;  %v147_v16 = vand.u32 127, %v146_v15 }
  0x39   :  { %v232_v10 = vpack.c.bf16 %v62_v9, %v61_v8  ;;  %v64_v12 = vld [vmem:[#allocation7 + $0x38] sm:$0xff]  ;;  %v55_v14 = vld [vmem:[#allocation2] sm:$0xff] }
  0x3a   :  { %227 = vmatpush3.bf16.msra.mxu0 %v226_v5  ;;  %v235_v13 = vpack.c.bf16 %v64_v12, %v63_v11  ;;  %vm149_vm2 = vcmp.ge.s32.totalorder %v147_v16, 32  ;;  %vm150_vm3 = vcmp.lt.s32.totalorder %v147_v16, 64  ;;  %v195_v17 = vld [vmem:[%s434_s3] ss:$0 sm:$0xff]  ;;  %v56_v29 = vld [vmem:[#allocation5] sm:$0xff]  ;;  %vm148_vm6 = vcmp.lt.s32.totalorder %v147_v16, 32 }
  0x3b   :  { %228 = vmatprep.subr.bf16.mxu0 %v350_v0  ;;  %vm151_vm4 = vmand %vm149_vm2, %vm150_vm3  ;;  %vm152_vm7 = vcmp.eq.s32.totalorder %v147_v16, 64  ;;  %s354_s3 = smov [#allocation8]  }
  0x3c   :  { %s185_s27 = sshll.u32 %s354_s3, 4  ;;  %s186_s27 = int_to_ptr.vmem [resolvable:$true] %s185_s27 }
  0x3d   :  { %s317_s28 = scalar_lea.vmem %s186_s27, 128  ;;  %p322_p11 = scmp.lt.s32.totalorder %s186_s27, %s186_s27 }
  0x3e   :  { %230 = vmatpush3.bf16.msra.mxu0 %v229_v7  ;;  %p318_p10 = scmp.ne.s32.totalorder %s186_s27, %s317_s28  ;;  %p323_p12 = scmp.lt.s32.totalorder %s317_s28, %s317_s28 }
  0x3f   :  { %231 = vmatprep.subr.bf16.mxu0 %v350_v0 }
  0x40   :  { %p324_p13 = por %p323_p12, %p322_p11 }
  0x42   :  { %233 = vmatpush3.bf16.msra.mxu0 %v232_v10  ;;  %p325_p0 = pnand %p324_p13, %p318_p10 }
  0x43   :  { %234 = vmatprep.subr.bf16.mxu0 %v350_v0 }
  0x46   :  { %236 = vmatpush3.bf16.msra.mxu0 %v235_v13 }
  0x49   :  { %223 = vmatmul.mubr.msk.f32.vlgmr.msra.gmra.mrb[0].mxu0 %vm72_vm1, %v55_v14 }
 0x11c   :  { %v142_v18 = vpop.f32.mrb[0].mxu0 }
 0x11d   :  { %v143_v19 = vadd.f32 %v195_v17, %v142_v18  ;;  %v224_v20 = vpop.f32.mrb[1].mxu0 }
 0x11f   :  { %v153_v21 = vsel %vm151_vm4, %v143_v19, -inf  ;;  %v164_v30 = vsub.f32 %v56_v29, %v143_v19  ;;  %v163_v35 = vsel %vm148_vm6, %v143_v19, 0.0 }
 0x120   :  { %154 = vmax.xlane.f32.xlu0 %v153_v21 }
 0x1ad   :  { %v155_v22 = vpop.xlane.xlu0 %154 }
 0x1ae   :  { %v156_v23 = vsub.f32 %v153_v21, %v155_v22 }
 0x1b0   :  { %v157_v24 = vmul.f32 1.442695, %v156_v23 }
 0x1b2   :  { %247 = vpow2.f32 %v157_v24 }
 0x1bc   :  { %v248_v25 = vpop.eup %247 }
 0x1bd   :  { %159 = vadd.xlane.f32.xlu0 %v248_v25 }
 0x24a   :  { %v160_v26 = vpop.xlane.xlu0 %159 }
 0x24b   :  { %249 = vrcp.f32 %v160_v26 }
 0x255   :  { %v250_v27 = vpop.eup %249 }
 0x256   :  { %v162_v28 = vmul.f32 %v250_v27, %v248_v25 }
 0x258   :  { %166 = vrot.lane.b32.xlu1 %v162_v28, %s353_s26  ;;  %v174_v37 = vadd.f32 %v163_v35, %v162_v28 }
 0x2ca   :  { %v167_v31 = vpop.permute.xlu1 %166 }
 0x2cb   :  { %v169_v32 = vmul.f32 %v167_v31, %v164_v30 }
 0x2cd   :  { %v171_v33 = vsel %vm170_vm5, %v169_v32, 0.0 }
 0x2ce   :  { %172 = vadd.xlane.f32.xlu1 %v171_v33 }
 0x35b   :  { %v173_v34 = vpop.xlane.xlu1 %172 }
 0x35c   :  { %v175_v36 = vadd.f32 %v173_v34, %v143_v19 }
 0x35e   :  { %v176_v38 = vsel %vm152_vm7, %v175_v36, 0.0 }
 0x35f   :  { %v177_v39 = vadd.f32 %v176_v38, %v174_v37 }
 0x361   :  { %178 = vst [vmem:[#allocation8] sm:$0xff] %v177_v39 }
 0x362   :  { %328 = shalt.err (!%p325_p0)
}
 0x363   :  { %s329_s5 = scalar_lea.hbm %s435_s4, 128 }
 0x364   :  { %p330_p1 = scmp.ne.s32.totalorder %s435_s4, %s329_s5  ;;  %p333_p2 = scmp.lt.u32.totalorder %s329_s5, %s435_s4 }
 0x366   :  { %p335_p3 = pnand %p333_p2, %p330_p1 }
 0x368   :  { %338 = shalt.err (!%p335_p3)
}
 0x369   :  { %188 = dma.vmem_to_hbm [thread:$0]  %s186_s27, 128, %s435_s4, [#allocation4]  }
 0x36a   :  { %343 = dma.done.wait [#allocation4], 128  }
 0x36b   :  { %344 = vsyncadd [#allocation4], 4294967168 }
 0x36c   :  { %192 = vsyncpa [#allocation3], 1 }
 0x36d   :  { %193 = vsyncpa [#allocation6], 1 }
 0x36e   :  { %194 = vsyncpa [#allocation4], 1 }

</bundles_post_ra>
